<compile_context>
chip_gen: v5e
topology: v5e:2x2
jax: 0.10.0
libtpu: 0.0.40
codegen_flags: <defaults>
</compile_context>

<pallas_src>
import jax
import jax.numpy as jnp
from jax.experimental import pallas as pl
from jax.experimental.pallas import tpu as pltpu


def _round_up(x, m):
    return ((x + m - 1) // m) * m


def _vmem_capacity_bytes():
    """Physical VMEM per TensorCore; conservative fallback if the query is unavailable."""
    try:
        info = pltpu.get_tpu_info()
        cap = int(getattr(info, "vmem_capacity_bytes", 0) or 0)
        if cap > 0:
            return cap
    except Exception:
        pass
    return 64 * 1024 * 1024          # v7x-sized fallback (smallest current generation)


def _pick_pack(groups, cg_out, w_bytes, mxu_target_lanes):
    """Largest divisor of `groups` packed per block-diagonal matmul (fills MXU width)."""
    pk = 1
    for d in range(1, groups + 1):
        if (groups % d == 0 and d * cg_out <= mxu_target_lanes
                and d * w_bytes <= 8 * 1024 * 1024):
            pk = d
    return pk


def _pick_tile_l(L_out, N, stride, K, C_in, C_out, n_packs, pci, pco, use_im2col,
                 act_bytes, max_tile_l, budget_bytes):
    """Largest multiple-of-8 output tile whose per-tile working set fits the VMEM budget."""
    cap = max(8, _round_up(min(max_tile_l, L_out), 8))
    if N == 1 and L_out >= 16:
        # keep >= 2 length tiles so dual-TensorCore chips (v7x) can shard the grid
        cap = min(cap, max(8, _round_up(-(-L_out // 2), 8)))
    # tile-size independent residents: phase-split input block (double-buffered) + weights
    fixed = (2 * stride * (L_out + K) * C_in * act_bytes
             + 2 * n_packs * K * pci * pco * act_bytes
             + 4 * C_out)
    tile = cap
    while tile > 8:
        per_tile = (2 * tile * C_out * act_bytes      # double-buffered output block
                    + tile * pco * 4                  # f32 accumulator
                    + tile * C_out * 4)               # epilogue temp
        if use_im2col:
            per_tile += tile * K * pci * act_bytes    # im2col operand
        else:
            per_tile += 2 * tile * pci * act_bytes    # tap operands in flight
        if fixed + per_tile <= budget_bytes:
            break
        tile -= 8
    return tile


def _make_conv_kernel(K, stride, n_packs, pci, pco, tile_l, use_im2col, apply_leaky,
                      neg_slope=0.1):
    """One grouped-Conv1d layer.

    x_ref : (stride, Lp, C_in)  phase-split padded input (batch dim squeezed)
    w_ref : block-diagonal packed weights ((P, K*pci, pco) or (P, K, pci, pco))
    b_ref : (1, C_out) f32 bias
    o_ref : (tile_l, C_out) output tile
    """

    def kernel(x_ref, w_ref, b_ref, o_ref):
        t = pl.program_id(1)
        row0 = t * tile_l                               # tile_l % 8 == 0 -> aligned start
        bias = b_ref[...]                               # (1, C_out) f32

        def tap(k, c0):
            # Tap k of the conv window: phase plane k % stride, decimated row offset
            # k // stride.  Dense, unstrided (tile_l, pci) load.
            return x_ref[k % stride, pl.ds(row0 + (k // stride), tile_l), c0:c0 + pci]

        # n_packs is small (<= groups); each pack keeps only one accumulator live.
        # TODO(synk): for very large K (e.g. 41) convert the tap loop to lax.fori_loop to
        # bound code size / live ranges further.
        for p in range(n_packs):
            c0 = p * pci
            if use_im2col:
                taps = [tap(k, c0) for k in range(K)]
                xg = taps[0] if K == 1 else jnp.concatenate(taps, axis=-1)
                acc = jnp.dot(xg, w_ref[p], preferred_element_type=jnp.float32)
            else:
                acc = jnp.zeros((tile_l, pco), jnp.float32)
                for k in range(K):
                    acc = acc + jnp.dot(tap(k, c0), w_ref[p, k],
                                        preferred_element_type=jnp.float32)
            y = acc + bias[:, p * pco:(p + 1) * pco]
            if apply_leaky:
                y = jnp.where(y >= 0.0, y, neg_slope * y)
            # Direct write into this pack's lane slice of the output block (no concat of
            # group outputs; a single full-width store when n_packs == 1).
            o_ref[:, p * pco:(p + 1) * pco] = y.astype(o_ref.dtype)

    return kernel


def conv1d_pallas(x_nlc, w, b, *, stride, groups, apply_leaky,
                  compute_dtype=jnp.bfloat16, max_tile_l=1024,
                  im2col_max_depth=256, mxu_target_lanes=256):
    """Grouped Conv1d (PyTorch semantics, padding=(K-1)//2) + optional LeakyReLU(0.1).

    x_nlc : (N, L, C_in); w : (C_out, C_in // groups, K); b : (C_out,).
    Returns (N, L_out, C_out) in compute_dtype.
    """
    N, L, C_in = x_nlc.shape
    C_out, cg_in, K = w.shape
    assert C_in % groups == 0 and C_out % groups == 0 and cg_in == C_in // groups
    cg_out = C_out // groups
    pad = (K - 1) // 2
    L_out = (L + 2 * pad - K) // stride + 1
    act_bytes = jnp.dtype(compute_dtype).itemsize

    # Pack `pk` groups per block-diagonal matmul so the MXU sees up to 256 output lanes.
    pk = _pick_pack(groups, cg_out, C_out * cg_in * K * act_bytes, mxu_target_lanes)
    n_packs = groups // pk
    pci, pco = pk * cg_in, pk * cg_out
    use_im2col = (K * pci) <= im2col_max_depth

    # Generation-aware VMEM budgeting (~48 MiB limit on v7x, ~96 MiB on v5e/v6e).
    vmem_cap = _vmem_capacity_bytes()
    vmem_limit = int(vmem_cap * 0.75)
    budget = int(vmem_cap * 0.40)
    tile_l = _pick_tile_l(L_out, N, stride, K, C_in, C_out, n_packs, pci, pco,
                          use_im2col, act_bytes, max_tile_l, budget)
    T = -(-L_out // tile_l)                              # number of length tiles

    # Phase-split padded input: padded row i lands at plane i % stride, row i // stride,
    # so every tap load inside the kernel is dense and unstrided.
    Lp = T * tile_l + (K - 1) // stride                  # decimated rows per phase plane
    total = stride * Lp
    x_cd = x_nlc.astype(compute_dtype)
    x_pad = jnp.pad(x_cd, ((0, 0), (pad, max(0, total - pad - L)), (0, 0)))[:, :total, :]
    x_ph = x_pad.reshape(N, Lp, stride, C_in).transpose(0, 2, 1, 3)   # (N, stride, Lp, C_in)
    # TODO(synk): fuse this pad / phase-split pass into the producing layer's epilogue
    # (or zero-fill the halo in-kernel) to remove one XLA pass over the activations.

    # Block-diagonal packed weights: row index = k*pci + (g_local*cg_in + ci),
    # column index = g_local*cg_out + co  (matches the im2col lane ordering above).
    wg = w.reshape(n_packs, pk, cg_out, cg_in, K)
    wz = jnp.zeros((n_packs, K, pk, cg_in, pk, cg_out), w.dtype)
    for gl in range(pk):
        blk = jnp.transpose(wg[:, gl], (0, 3, 2, 1))     # (n_packs, K, cg_in, cg_out)
        wz = wz.at[:, :, gl, :, gl, :].set(blk)
    if use_im2col:
        w_packed = wz.reshape(n_packs, K * pci, pco).astype(compute_dtype)
    else:
        w_packed = wz.reshape(n_packs, K, pci, pco).astype(compute_dtype)
    b2 = b.reshape(1, C_out).astype(jnp.float32)
    wnd = w_packed.ndim

    kernel = _make_conv_kernel(K, stride, n_packs, pci, pco, tile_l, use_im2col,
                               apply_leaky)

    out = pl.pallas_call(
        kernel,
        out_shape=jax.ShapeDtypeStruct((N, L_out, C_out), compute_dtype),
        grid=(N, T),
        in_specs=[
            # Full phase-split input per batch element: constant along the length-tile
            # axis, so it is DMA'd once per batch element and stays VMEM-resident.
            # TODO(synk): for very long sequences switch this to windowed length blocks.
            pl.BlockSpec((None, stride, Lp, C_in), lambda n, t: (n, 0, 0, 0)),
            # Weights / bias: constant index maps -> fetched once, never re-DMA'd.
            pl.BlockSpec(w_packed.shape, lambda n, t: (0,) * wnd),
            pl.BlockSpec((1, C_out), lambda n, t: (0, 0)),
        ],
        out_specs=pl.BlockSpec((None, tile_l, C_out), lambda n, t: (n, t, 0)),
        compiler_params=pltpu.CompilerParams(
            dimension_semantics=("parallel", "parallel"),
            vmem_limit_bytes=vmem_limit),
    )(x_ph, w_packed, b2)
    # out_shape is exactly (N, L_out, C_out); the overhang of the last length tile is
    # clipped by Pallas, so no post-call trim is needed.
    return out


def sub_msd_forward(params, x_ncl, *, compute_dtype=jnp.bfloat16, max_tile_l=1024,
                    im2col_max_depth=256, mxu_target_lanes=256):
    """Forward pass of SubMultiScaleDiscriminator (inputs / outputs in PyTorch NCL)."""
    x = jnp.transpose(x_ncl, (0, 2, 1))              # NCL -> NLC once at the boundary
    feats_nlc = []
    for p in params:
        x = conv1d_pallas(x, p["w"], p["b"], stride=p["stride"], groups=p["groups"],
                          apply_leaky=p["leaky"], compute_dtype=compute_dtype,
                          max_tile_l=max_tile_l, im2col_max_depth=im2col_max_depth,
                          mxu_target_lanes=mxu_target_lanes)
        feats_nlc.append(x)                          # activations stay NLC / compute_dtype
    # TODO(synk): fuse the final C_out == 1 conv into the previous layer's epilogue (or
    # give it an L-on-lanes output layout) to avoid its masked 1-lane stores.
    feats = [jnp.transpose(f, (0, 2, 1)).astype(jnp.float32) for f in feats_nlc]
    return feats[-1], feats


# ----------------------- pure-JAX reference (for checking) ------------------
def conv1d_ref(x_ncl, w, b, *, stride, groups, apply_leaky):
    K = w.shape[-1]
    pad = (K - 1) // 2
    y = jax.lax.conv_general_dilated(
        x_ncl, w, window_strides=(stride,), padding=[(pad, pad)],
        dimension_numbers=("NCH", "OIH", "NCH"), feature_group_count=groups)
    y = y + b[None, :, None]
    if apply_leaky:
        y = jnp.where(y >= 0.0, y, 0.1 * y)
    return y


def sub_msd_ref(params, x_ncl):
    x = x_ncl
    feats = []
    for p in params:
        x = conv1d_ref(x, p["w"], p["b"], stride=p["stride"],
                       groups=p["groups"], apply_leaky=p["leaky"])
        feats.append(x)
    return x, feats


if __name__ == "__main__":
    # Small config consistent with the module's __init__ signature.
    kernel_sizes = [5, 5, 3]
    strides = [1, 2, 1]
    groups_cfg = [1, 2, 4]
    channels = [1, 8, 16, 16]
    N, L = 2, 128

    key = jax.random.PRNGKey(0)
    n_layers = len(kernel_sizes) + 1  # hidden convs + final 1-channel conv
    keys = jax.random.split(key, 2 * n_layers + 1)

    params = []
    for i in range(len(kernel_sizes)):
        c_in, c_out = channels[i], channels[i + 1]
        k, s, g = kernel_sizes[i], strides[i], groups_cfg[i]
        w = 0.3 * jax.random.normal(keys[2 * i], (c_out, c_in // g, k), jnp.float32)
        bb = 0.3 * jax.random.normal(keys[2 * i + 1], (c_out,), jnp.float32)
        params.append(dict(w=w, b=bb, stride=s, groups=g, leaky=True))
    # Final conv: Conv1d(channels[-1], 1, kernel=3, stride=1, pad=1), no activation.
    w = 0.3 * jax.random.normal(keys[2 * len(kernel_sizes)], (1, channels[-1], 3), jnp.float32)
    bb = 0.3 * jax.random.normal(keys[2 * len(kernel_sizes) + 1], (1,), jnp.float32)
    params.append(dict(w=w, b=bb, stride=1, groups=1, leaky=False))

    x = jax.random.normal(keys[-1], (N, channels[0], L), jnp.float32)

    out_ref, feats_ref = sub_msd_ref(params, x)

    def check(out, feats, rtol, atol, tag):
        assert out.shape == out_ref.shape, (tag, out.shape, out_ref.shape)
        ok = bool(jnp.allclose(out, out_ref, rtol=rtol, atol=atol))
        for f, fr in zip(feats, feats_ref):
            assert f.shape == fr.shape, (tag, f.shape, fr.shape)
            ok = ok and bool(jnp.allclose(f, fr, rtol=rtol, atol=atol))
        assert ok, f"Pallas output does not match reference conv ({tag})"

    configs = [
        # f32, single length tile per layer, packed im2col dots
        dict(compute_dtype=jnp.float32, max_tile_l=1024, im2col_max_depth=256,
             mxu_target_lanes=256, rtol=2e-2, atol=2e-2, tag="f32/single-tile"),
        # f32, multiple (incl. partial) length tiles
        dict(compute_dtype=jnp.float32, max_tile_l=48, im2col_max_depth=256,
             mxu_target_lanes=256, rtol=2e-2, atol=2e-2, tag="f32/multi-tile"),
        # f32, force the per-tap accumulating-dot path
        dict(compute_dtype=jnp.float32, max_tile_l=1024, im2col_max_depth=0,
             mxu_target_lanes=256, rtol=2e-2, atol=2e-2, tag="f32/per-tap"),
        # f32, force per-group (multi-pack) dots with lane-slice output writes
        dict(compute_dtype=jnp.float32, max_tile_l=1024, im2col_max_depth=256,
             mxu_target_lanes=1, rtol=2e-2, atol=2e-2, tag="f32/per-group"),
        # bf16 activations/weights, f32 accumulation (default production path)
        dict(compute_dtype=jnp.bfloat16, max_tile_l=1024, im2col_max_depth=256,
             mxu_target_lanes=256, rtol=5e-2, atol=5e-2, tag="bf16"),
    ]
    for cfg in configs:
        out, feats = sub_msd_forward(
            params, x,
            compute_dtype=cfg["compute_dtype"], max_tile_l=cfg["max_tile_l"],
            im2col_max_depth=cfg["im2col_max_depth"],
            mxu_target_lanes=cfg["mxu_target_lanes"])
        out = jax.block_until_ready(out)
        feats = [jax.block_until_ready(f) for f in feats]
        check(out, feats, cfg["rtol"], cfg["atol"], cfg["tag"])

    print("KERNEL_OK")
</pallas_src>

<mosaic_0001>
module attributes {stable_mosaic.version = 11 : i64} {
  func.func @kernel(%arg0: i32, %arg1: i32, %arg2: memref<1x1x132x1xf32, #tpu.memory_space<vmem>>, %arg3: memref<1x5x8xf32, #tpu.memory_space<vmem>>, %arg4: memref<1x8xf32, #tpu.memory_space<vmem>>, %arg5: memref<1x128x8xf32, #tpu.memory_space<vmem>>) attributes {dimension_semantics = [#tpu.dimension_semantics<parallel>, #tpu.dimension_semantics<parallel>], iteration_bounds = array<i64: 2, 1>, scalar_prefetch = 0 : i64, scratch_operands = 0 : i64, tpu.core_type = #tpu.core_type<tc>, window_params = [{transform_indices = @transform_0, window_bounds = array<i64: 1, 1, 132, 1>}, {pipeline_mode = #tpu.pipeline_mode<synchronous>, transform_indices = @transform_1, window_bounds = array<i64: 1, 5, 8>}, {pipeline_mode = #tpu.pipeline_mode<synchronous>, transform_indices = @transform_2, window_bounds = array<i64: 1, 8>}, {transform_indices = @transform_3, window_bounds = array<i64: 1, 128, 8>}]} {
    %c128_i32 = arith.constant 128 : i32
    %0 = arith.muli %arg1, %c128_i32 : i32
    %c0 = arith.constant 0 : index
    %c0_0 = arith.constant 0 : index
    %1 = vector.load %arg4[%c0, %c0_0] : memref<1x8xf32, #tpu.memory_space<vmem>>, vector<1x8xf32>
    %c0_i32 = arith.constant 0 : i32
    %2 = arith.addi %0, %c0_i32 : i32
    %c0_1 = arith.constant 0 : index
    %c0_2 = arith.constant 0 : index
    %3 = arith.index_cast %2 : i32 to index
    %c0_3 = arith.constant 0 : index
    %4 = vector.load %arg2[%c0_1, %c0_2, %3, %c0_3] : memref<1x1x132x1xf32, #tpu.memory_space<vmem>>, vector<1x1x128x1xf32>
    %5 = vector.shape_cast %4 : vector<1x1x128x1xf32> to vector<128x1xf32>
    %c1_i32 = arith.constant 1 : i32
    %6 = arith.addi %0, %c1_i32 : i32
    %c0_4 = arith.constant 0 : index
    %c0_5 = arith.constant 0 : index
    %7 = arith.index_cast %6 : i32 to index
    %c0_6 = arith.constant 0 : index
    %8 = vector.load %arg2[%c0_4, %c0_5, %7, %c0_6] : memref<1x1x132x1xf32, #tpu.memory_space<vmem>>, vector<1x1x128x1xf32>
    %9 = vector.shape_cast %8 : vector<1x1x128x1xf32> to vector<128x1xf32>
    %c2_i32 = arith.constant 2 : i32
    %10 = arith.addi %0, %c2_i32 : i32
    %c0_7 = arith.constant 0 : index
    %c0_8 = arith.constant 0 : index
    %11 = arith.index_cast %10 : i32 to index
    %c0_9 = arith.constant 0 : index
    %12 = vector.load %arg2[%c0_7, %c0_8, %11, %c0_9] : memref<1x1x132x1xf32, #tpu.memory_space<vmem>>, vector<1x1x128x1xf32>
    %13 = vector.shape_cast %12 : vector<1x1x128x1xf32> to vector<128x1xf32>
    %c3_i32 = arith.constant 3 : i32
    %14 = arith.addi %0, %c3_i32 : i32
    %c0_10 = arith.constant 0 : index
    %c0_11 = arith.constant 0 : index
    %15 = arith.index_cast %14 : i32 to index
    %c0_12 = arith.constant 0 : index
    %16 = vector.load %arg2[%c0_10, %c0_11, %15, %c0_12] : memref<1x1x132x1xf32, #tpu.memory_space<vmem>>, vector<1x1x128x1xf32>
    %17 = vector.shape_cast %16 : vector<1x1x128x1xf32> to vector<128x1xf32>
    %c4_i32 = arith.constant 4 : i32
    %18 = arith.addi %0, %c4_i32 : i32
    %c0_13 = arith.constant 0 : index
    %c0_14 = arith.constant 0 : index
    %19 = arith.index_cast %18 : i32 to index
    %c0_15 = arith.constant 0 : index
    %20 = vector.load %arg2[%c0_13, %c0_14, %19, %c0_15] : memref<1x1x132x1xf32, #tpu.memory_space<vmem>>, vector<1x1x128x1xf32>
    %21 = vector.shape_cast %20 : vector<1x1x128x1xf32> to vector<128x1xf32>
    %22 = tpu.concatenate %5, %9, %13, %17, %21 in 1 : vector<128x1xf32>, vector<128x1xf32>, vector<128x1xf32>, vector<128x1xf32>, vector<128x1xf32> -> vector<128x5xf32>
    %c0_16 = arith.constant 0 : index
    %c0_17 = arith.constant 0 : index
    %c0_18 = arith.constant 0 : index
    %23 = vector.load %arg3[%c0_16, %c0_17, %c0_18] : memref<1x5x8xf32, #tpu.memory_space<vmem>>, vector<1x5x8xf32>
    %24 = vector.shape_cast %23 : vector<1x5x8xf32> to vector<5x8xf32>
    %cst = arith.constant dense<0.000000e+00> : vector<128x8xf32>
    %25 = tpu.matmul %22, %24, %cst {dimension_numbers = #tpu.dot_dimension_numbers<[1], [0], [0], [1], [0, 0, 1, 1], [], []>} : vector<128x5xf32>, vector<5x8xf32>, vector<128x8xf32> -> vector<128x8xf32>
    %26 = vector.broadcast %1 : vector<1x8xf32> to vector<128x8xf32>
    %27 = arith.addf %25, %26 : vector<128x8xf32>
    %cst_19 = arith.constant 0.000000e+00 : f32
    %28 = vector.broadcast %cst_19 : f32 to vector<128x8xf32>
    %29 = arith.cmpf oge, %27, %28 : vector<128x8xf32>
    %cst_20 = arith.constant 1.000000e-01 : f32
    %30 = vector.broadcast %cst_20 : f32 to vector<128x8xf32>
    %31 = arith.mulf %30, %27 : vector<128x8xf32>
    %32 = arith.select %29, %27, %31 : vector<128x8xi1>, vector<128x8xf32>
    %c0_21 = arith.constant 0 : index
    %c0_22 = arith.constant 0 : index
    %c0_23 = arith.constant 0 : index
    %33 = vector.load %arg5[%c0_21, %c0_22, %c0_23] : memref<1x128x8xf32, #tpu.memory_space<vmem>>, vector<1x128x8xf32>
    %34 = vector.shape_cast %33 : vector<1x128x8xf32> to vector<128x8xf32>
    %35 = vector.shape_cast %32 : vector<128x8xf32> to vector<1x128x8xf32>
    tpu.vector_store %arg5[%c0_21, %c0_22, %c0_23], %35 {strides = array<i32>} : memref<1x128x8xf32, #tpu.memory_space<vmem>>, vector<1x128x8xf32>,
    return
  }
  func.func @transform_0(%arg0: i32, %arg1: i32) -> (i32, i32, i32, i32) {
    %c0_i32 = arith.constant 0 : i32
    %c0_i32_0 = arith.constant 0 : i32
    %c0_i32_1 = arith.constant 0 : i32
    %c0_i32_2 = arith.constant 0 : i32
    return %arg0, %c0_i32, %c0_i32_0, %c0_i32_1 : i32, i32, i32, i32
  }
  func.func @transform_1(%arg0: i32, %arg1: i32) -> (i32, i32, i32) {
    %c0_i32 = arith.constant 0 : i32
    %c0_i32_0 = arith.constant 0 : i32
    %c0_i32_1 = arith.constant 0 : i32
    %c0_i32_2 = arith.constant 0 : i32
    return %c0_i32, %c0_i32_0, %c0_i32_1 : i32, i32, i32
  }
  func.func @transform_2(%arg0: i32, %arg1: i32) -> (i32, i32) {
    %c0_i32 = arith.constant 0 : i32
    %c0_i32_0 = arith.constant 0 : i32
    %c0_i32_1 = arith.constant 0 : i32
    return %c0_i32, %c0_i32_0 : i32, i32
  }
  func.func @transform_3(%arg0: i32, %arg1: i32) -> (i32, i32, i32) {
    %c0_i32 = arith.constant 0 : i32
    %c0_i32_0 = arith.constant 0 : i32
    return %arg0, %arg1, %c0_i32 : i32, i32, i32
  }
}

</mosaic_0001>

<bundles_post_ra>
// kernel: tpu_custom_call.1
= control target key start
LH: loop header
LB: loop body
LE: loop exit
PB: predicated region body
PF: predicated region fallthrough
CT: control target
= control target key end

     0   :  { %s1064_s12 = smov 0   ;;  %s1066_s13 = smov 0   ;;  %s1391_s0 = inlined_call_operand.vmem [shape: f32[2,1,132,1], index: 0, kind: input, shape index: {}]   ;;  %s1392_s1 = inlined_call_operand.vmem [shape: f32[1,5,8], index: 1, kind: input, shape index: {}]   ;;  %s1393_s2 = inlined_call_operand.vmem [shape: f32[1,8], index: 2, kind: input, shape index: {}]   ;;  %s1394_s3 = inlined_call_operand.vmem [shape: f32[2,128,8], index: 3, kind: output, shape index: {}]  }
   0x1   :  { %s1068_s14 = smov 0  }
   0x2 LB: > { %s25_s15 = sadd.s32 1, %s1034_s13  ;;  %p895_p0 = scmp.ge.s32.totalorder %s1038_s14, 1  ;;  %s1038_s14 = sphi %s1068_s14, %s13_s14   ;;  %s1034_s13 = sphi %s1066_s13, %s1396_s13   ;;  %s1030_s12 = sphi %s1064_s12, %s1395_s12  }
   0x3   : > { %p27_p1 = scmp.ge.s32.totalorder %s25_s15, 2  ;;  %p151_p2 = scmp.lt.s32.totalorder %s1038_s14, 3 }
   0x5   : > { %s1398_s15 = smov (%p27_p1, %s25_s15), 0  ;;  %p152_p3 = pnand %p895_p0, %p151_p2 }
   0x6   : > { %p179_p4 = scmp.lt.s32.totalorder (!%p152_p3), %s1030_s12, 1  ;;  %s1040_s20 = smov (!%p152_p3), 2  }
   0x7   : > { %155 = sbr.rel (%p152_p3) target bundleno = 434 (0x1b2), region = 32  ;;  %s1041_s21 = smov (!%p152_p3), 1  }
   0x8   : > { %s1042_s22 = smov (!%p152_p3), 3   ;;  %s1043_s23 = smov (!%p152_p3), 4  }
   0xc   : > { %s1400_s12 = smov (!%p179_p4, %s1030_s12), 1  ;;  %v609_v40 = vld [vmem:[%s1392_s1] sm:$0x1f]  ;;  %vm662_vm0 = vcmask 1044480   ;;  %vm541_vm1 = vcmask 7168   ;;  %vm558_vm2 = vcmask 15360  }
   0xd   : > { %s986_s16 = smul.u32 136, %s1400_s12  ;;  %984 = vmatpush.msk.msra.mxu2 %vm662_vm0, %v609_v40  ;;  %985 = vmatpush.msk.msra.mxu3 %vm662_vm0, %v609_v40  ;;  %vm575_vm3 = vcmask 23552   ;;  %vm592_vm4 = vcmask 31744   ;;  %vm613_vm5 = vcmask 39936   ;;  %s982_s28 = sshll.u32 %s1400_s12, 7  ;;  %vm779_vm6 = vcmask 64512  }
   0xe   : > { %963 = vmatpush.msk.msra.mxu0 %vm662_vm0, %v609_v40  ;;  %983 = vmatpush.msk.msra.mxu1 %vm662_vm0, %v609_v40  ;;  %s1322_s4 = scalar_lea.vmem %s1394_s3, %s982_s28 }
   0xf   : > { %s1088_s19 = scalar_lea.vmem %s1391_s0, %s986_s16 }
  0x10   : > { %v923_v0 = vld [vmem:[%s1088_s19 + $0x42] sm:$0xff]  ;;  %v924_v15 = vld [vmem:[%s1088_s19 + $0x4a] sm:$0xff]  ;;  %v925_v32 = vld [vmem:[%s1088_s19 + $0x52] sm:$0xff] }
  0x11   : > { %v907_v1 = vld [vmem:[%s1088_s19 + $0x41] sm:$0xff]  ;;  %381 = vrot.lane.b32.xlu1 %v923_v0, %s1040_s20  ;;  %v912_v12 = vld [vmem:[%s1088_s19 + $0x69] sm:$0xff]  ;;  %v909_v27 = vld [vmem:[%s1088_s19 + $0x51] sm:$0xff] }
  0x12   : > { %317 = vrot.lane.b32.xlu0 %v907_v1, %s1041_s21  ;;  %v939_v2 = vld [vmem:[%s1088_s19 + $0x43] sm:$0xff]  ;;  %v940_v20 = vld [vmem:[%s1088_s19 + $0x4b] sm:$0xff]  ;;  %v945_v37 = vld [vmem:[%s1088_s19 + $0x73] sm:$0xff] }
  0x13   : > { %445 = vrot.lane.b32.xlu2 %v939_v2, %s1042_s22  ;;  %v927_v3 = vld [vmem:[%s1088_s19 + $0x62] sm:$0xff]  ;;  %v928_v17 = vld [vmem:[%s1088_s19 + $0x6a] sm:$0xff]  ;;  %v929_v34 = vld [vmem:[%s1088_s19 + $0x72] sm:$0xff] }
  0x14   : > { %v911_v4 = vld [vmem:[%s1088_s19 + $0x61] sm:$0xff]  ;;  %v908_v13 = vld [vmem:[%s1088_s19 + $0x49] sm:$0xff]  ;;  %v913_v29 = vld [vmem:[%s1088_s19 + $0x71] sm:$0xff] }
  0x15   : > { %v943_v5 = vld [vmem:[%s1088_s19 + $0x63] sm:$0xff]  ;;  %v956_v21 = vld [vmem:[%s1088_s19 + $0x4c] sm:$0xff]  ;;  %v957_v39 = vld [vmem:[%s1088_s19 + $0x54] sm:$0xff] }
  0x16   : > { %v959_v6 = vld [vmem:[%s1088_s19 + $0x64] sm:$0xff]  ;;  %v960_v23 = vld [vmem:[%s1088_s19 + $0x6c] sm:$0xff]  ;;  %v961_v43 = vld [vmem:[%s1088_s19 + $0x74] sm:$0xff] }
  0x17   : > { %v955_v7 = vld [vmem:[%s1088_s19 + $0x44] sm:$0xff]  ;;  %v948_v33 = vld [vmem:[%s1088_s19 + $0xc] sm:$0xff]  ;;  %v910_v48 = vld [vmem:[%s1088_s19 + $0x59] sm:$0xff] }
  0x18   : > { %v899_v8 = vld [vmem:[%s1088_s19 + $0x1] sm:$0xff]  ;;  %v944_v22 = vld [vmem:[%s1088_s19 + $0x6b] sm:$0xff]  ;;  %v941_v38 = vld [vmem:[%s1088_s19 + $0x53] sm:$0xff] }
  0x19   : > { %389 = vrot.lane.b32.xlu1 %v927_v3, %s1040_s20  ;;  %v915_v9 = vld [vmem:[%s1088_s19 + $0x2] sm:$0xff]  ;;  %v916_v26 = vld [vmem:[%s1088_s19 + $0xa] sm:$0xff]  ;;  %v921_v46 = vld [vmem:[%s1088_s19 + $0x32] sm:$0xff] }
  0x1a   : > { %325 = vrot.lane.b32.xlu0 %v911_v4, %s1041_s21  ;;  %v903_v10 = vld [vmem:[%s1088_s19 + $0x21] sm:$0xff]  ;;  %v904_v24 = vld [vmem:[%s1088_s19 + $0x29] sm:$0xff]  ;;  %v901_v42 = vld [vmem:[%s1088_s19 + $0x11] sm:$0xff] }
  0x1b   : > { %453 = vrot.lane.b32.xlu2 %v943_v5, %s1042_s22  ;;  %v919_v11 = vld [vmem:[%s1088_s19 + $0x22] sm:$0xff]  ;;  %v920_v28 = vld [vmem:[%s1088_s19 + $0x2a] sm:$0xff]  ;;  %v917_v47 = vld [vmem:[%s1088_s19 + $0x12] sm:$0xff] }
  0x1c   : > { %v931_v14 = vld [vmem:[%s1088_s19 + $0x3] sm:$0xff]  ;;  %v936_v30 = vld [vmem:[%s1088_s19 + $0x2b] sm:$0xff]  ;;  %v933_v52 = vld [vmem:[%s1088_s19 + $0x13] sm:$0xff] }
  0x1d   : > { %v935_v16 = vld [vmem:[%s1088_s19 + $0x23] sm:$0xff]  ;;  %v932_v31 = vld [vmem:[%s1088_s19 + $0xb] sm:$0xff]  ;;  %v914_v53 = vld [vmem:[%s1088_s19 + $0x79] sm:$0xff] }
  0x1e   : > { %v951_v18 = vld [vmem:[%s1088_s19 + $0x24] sm:$0xff]  ;;  %v952_v35 = vld [vmem:[%s1088_s19 + $0x2c] sm:$0xff]  ;;  %v930_v62 = vld [vmem:[%s1088_s19 + $0x7a] sm:$0xff] }
  0x1f   : > { %v947_v19 = vld [vmem:[%s1088_s19 + $0x4] sm:$0xff]  ;;  %v905_v44 = vld [vmem:[%s1088_s19 + $0x31] sm:$0xff]  ;;  %v926_v63 = vld [vmem:[%s1088_s19 + $0x5a] sm:$0xff] }
  0x20   : > { %v900_v25 = vld [vmem:[%s1088_s19 + $0x9] sm:$0xff]  ;;  %v937_v54 = vld [vmem:[%s1088_s19 + $0x33] sm:$0xff]  ;;  %v205_v55 = vld [vmem:[%s1088_s19 + $0x40] sm:$0xff] }
  0x21   : > { %517 = vrot.lane.b32.xlu1 %v959_v6, %s1043_s23  ;;  %v209_v56 = vld [vmem:[%s1088_s19 + $0x60] sm:$0xff]  ;;  %v949_v2 = vld [vmem:[%s1088_s19 + $0x14] sm:$0xff] }
  0x22   : > { %509 = vrot.lane.b32.xlu0 %v955_v7, %s1043_s23 }
  0x23   : > { %301 = vrot.lane.b32.xlu2 %v899_v8, %s1041_s21 }
  0x29   : > { %365 = vrot.lane.b32.xlu1 %v915_v9, %s1040_s20 }
  0x2a   : > { %309 = vrot.lane.b32.xlu0 %v903_v10, %s1041_s21  ;;  %v942_v10 = vld [vmem:[%s1088_s19 + $0x5b] sm:$0xff] }
  0x2b   : > { %373 = vrot.lane.b32.xlu2 %v919_v11, %s1040_s20  ;;  %v953_v11 = vld [vmem:[%s1088_s19 + $0x34] sm:$0xff] }
  0x31   : > { %327 = vrot.lane.b32.xlu1 %v912_v12, %s1041_s21  ;;  %v946_v12 = vld [vmem:[%s1088_s19 + $0x7b] sm:$0xff] }
  0x32   : > { %319 = vrot.lane.b32.xlu0 %v908_v13, %s1041_s21 }
  0x33   : > { %429 = vrot.lane.b32.xlu2 %v931_v14, %s1042_s22 }
  0x39   : > { %383 = vrot.lane.b32.xlu1 %v924_v15, %s1040_s20 }
  0x3a   : > { %437 = vrot.lane.b32.xlu0 %v935_v16, %s1042_s22  ;;  %v962_v16 = vld [vmem:[%s1088_s19 + $0x7c] sm:$0xff] }
  0x3b   : > { %391 = vrot.lane.b32.xlu2 %v928_v17, %s1040_s20  ;;  %v958_v17 = vld [vmem:[%s1088_s19 + $0x5c] sm:$0xff] }
  0x41   : > { %501 = vrot.lane.b32.xlu1 %v951_v18, %s1043_s23  ;;  %v902_v18 = vld [vmem:[%s1088_s19 + $0x19] sm:$0xff] }
  0x42   : > { %493 = vrot.lane.b32.xlu0 %v947_v19, %s1043_s23 }
  0x43   : > { %447 = vrot.lane.b32.xlu2 %v940_v20, %s1042_s22 }
  0x49   : > { %511 = vrot.lane.b32.xlu1 %v956_v21, %s1043_s23 }
  0x4a   : > { %455 = vrot.lane.b32.xlu0 %v944_v22, %s1042_s22  ;;  %v918_v22 = vld [vmem:[%s1088_s19 + $0x1a] sm:$0xff] }
  0x4b   : > { %519 = vrot.lane.b32.xlu2 %v960_v23, %s1043_s23  ;;  %v906_v23 = vld [vmem:[%s1088_s19 + $0x39] sm:$0xff] }
  0x51   : > { %311 = vrot.lane.b32.xlu1 %v904_v24, %s1041_s21  ;;  %v922_v24 = vld [vmem:[%s1088_s19 + $0x3a] sm:$0xff] }
  0x52   : > { %303 = vrot.lane.b32.xlu0 %v900_v25, %s1041_s21  ;;  %v197_v25 = vld [vmem:[%s1088_s19] sm:$0xff] }
  0x53   : > { %367 = vrot.lane.b32.xlu2 %v916_v26, %s1040_s20 }
  0x59   : > { %321 = vrot.lane.b32.xlu1 %v909_v27, %s1041_s21 }
  0x5a   : > { %375 = vrot.lane.b32.xlu0 %v920_v28, %s1040_s20  ;;  %v201_v28 = vld [vmem:[%s1088_s19 + $0x20] sm:$0xff] }
  0x5b   : > { %329 = vrot.lane.b32.xlu2 %v913_v29, %s1041_s21 }
  0x61   : > { %439 = vrot.lane.b32.xlu1 %v936_v30, %s1042_s22 }
  0x62   : > { %431 = vrot.lane.b32.xlu0 %v932_v31, %s1042_s22  ;;  %v938_v31 = vld [vmem:[%s1088_s19 + $0x3b] sm:$0xff] }
  0x63   : > { %385 = vrot.lane.b32.xlu2 %v925_v32, %s1040_s20  ;;  %v934_v32 = vld [vmem:[%s1088_s19 + $0x1b] sm:$0xff] }
  0x69   : > { %495 = vrot.lane.b32.xlu1 %v948_v33, %s1043_s23 }
  0x6a   : > { %393 = vrot.lane.b32.xlu0 %v929_v34, %s1040_s20 }
  0x6b   : > { %503 = vrot.lane.b32.xlu2 %v952_v35, %s1043_s23  ;;  %v950_v35 = vld [vmem:[%s1088_s19 + $0x1c] sm:$0xff] }
  0x6d   : > { %v446_v36 = vpop.permute.xlu2 %445 }
  0x71   : > { %457 = vrot.lane.b32.xlu1 %v945_v37, %s1042_s22 }
  0x72   : > { %449 = vrot.lane.b32.xlu0 %v941_v38, %s1042_s22 }
  0x73   : > { %513 = vrot.lane.b32.xlu2 %v957_v39, %s1043_s23 }
  0x75   : > { %v454_v41 = vpop.permute.xlu2 %453 }
  0x79   : > { %305 = vrot.lane.b32.xlu1 %v901_v42, %s1041_s21 }
  0x7a   : > { %521 = vrot.lane.b32.xlu0 %v961_v43, %s1043_s23 }
  0x7b   : > { %313 = vrot.lane.b32.xlu2 %v905_v44, %s1041_s21  ;;  %v210_v44 = vld [vmem:[%s1088_s19 + $0x68] sm:$0xff] }
  0x7d   : > { %v1177_v45 = vpop.permute.xlu2 %301 }
  0x7e   : > { %v542_v29 = vsel %vm541_vm1, %v197_v25, %v1177_v45 }
  0x81   : > { %377 = vrot.lane.b32.xlu1 %v921_v46, %s1040_s20  ;;  %v954_v46 = vld [vmem:[%s1088_s19 + $0x3c] sm:$0xff] }
  0x82   : > { %369 = vrot.lane.b32.xlu0 %v917_v47, %s1040_s20 }
  0x83   : > { %v382_v49 = vpop.permute.xlu1 %381  ;;  %323 = vrot.lane.b32.xlu2 %v910_v48, %s1041_s21 }
  0x84   : > { %v318_v50 = vpop.permute.xlu0 %317 }
  0x85   : > { %v1185_v51 = vpop.permute.xlu2 %373  ;;  %v550_v59 = vsel %vm541_vm1, %v205_v55, %v318_v50 }
  0x86   : > { %v567_v0 = vsel %vm558_vm2, %v550_v59, %v382_v49 }
  0x87   : > { %v584_v5 = vsel %vm575_vm3, %v567_v0, %v446_v36 }
  0x89   : > { %433 = vrot.lane.b32.xlu1 %v933_v52, %s1042_s22 }
  0x8a   : > { %331 = vrot.lane.b32.xlu0 %v914_v53, %s1041_s21 }
  0x8b   : > { %v390_v57 = vpop.permute.xlu1 %389  ;;  %441 = vrot.lane.b32.xlu2 %v937_v54, %s1042_s22 }
  0x8c   : > { %v326_v58 = vpop.permute.xlu0 %325 }
  0x8d   : > { %v554_v60 = vsel %vm541_vm1, %v209_v56, %v326_v58  ;;  %v430_v61 = vpop.permute.xlu2 %429 }
  0x8e   : > { %v571_v1 = vsel %vm558_vm2, %v554_v60, %v390_v57 }
  0x8f   : > { %v588_v6 = vsel %vm575_vm3, %v571_v1, %v454_v41  ;;  %v206_v41 = vld [vmem:[%s1088_s19 + $0x48] sm:$0xff] }
  0x91   : > { %395 = vrot.lane.b32.xlu1 %v930_v62, %s1040_s20 }
  0x92   : > { %387 = vrot.lane.b32.xlu0 %v926_v63, %s1040_s20  ;;  %v202_v63 = vld [vmem:[%s1088_s19 + $0x28] sm:$0xff] }
  0x93   : > { %v518_v3 = vpop.permute.xlu1 %517  ;;  %497 = vrot.lane.b32.xlu2 %v949_v2, %s1043_s23 }
  0x94   : > { %v510_v4 = vpop.permute.xlu0 %509  ;;  %v605_v8 = vsel %vm592_vm4, %v588_v6, %v518_v3 }
  0x95   : > { %v601_v7 = vsel %vm592_vm4, %v584_v5, %v510_v4  ;;  %976 = vmatmul.msk.f32.vlgmr.msra.gmra.mxu3 %vm613_vm5, %v605_v8  ;;  %v392_v9 = vpop.permute.xlu2 %391  ;;  %v198_v5 = vld [vmem:[%s1088_s19 + $0x8] sm:$0xff] }
  0x96   : > { %972 = vmatmul.msk.f32.vlgmr.msra.gmra.mxu2 %vm613_vm5, %v601_v7 }
  0x99   : > { %451 = vrot.lane.b32.xlu1 %v942_v10, %s1042_s22 }
  0x9a   : > { %505 = vrot.lane.b32.xlu0 %v953_v11, %s1043_s23 }
  0x9b   : > { %v366_v13 = vpop.permute.xlu1 %365  ;;  %459 = vrot.lane.b32.xlu2 %v946_v12, %s1042_s22 }
  0x9c   : > { %v310_v14 = vpop.permute.xlu0 %309  ;;  %v559_v34 = vsel %vm558_vm2, %v542_v29, %v366_v13 }
  0x9d   : > { %v448_v15 = vpop.permute.xlu2 %447  ;;  %v546_v33 = vsel %vm541_vm1, %v201_v28, %v310_v14  ;;  %v576_v37 = vsel %vm575_vm3, %v559_v34, %v430_v61 }
  0x9e   : > { %v563_v36 = vsel %vm558_vm2, %v546_v33, %v1185_v51  ;;  %v199_v33 = vld [vmem:[%s1088_s19 + $0x10] sm:$0xff] }
  0xa1   : > { %523 = vrot.lane.b32.xlu1 %v962_v16, %s1043_s23 }
  0xa2   : > { %515 = vrot.lane.b32.xlu0 %v958_v17, %s1043_s23 }
  0xa3   : > { %v328_v19 = vpop.permute.xlu1 %327  ;;  %307 = vrot.lane.b32.xlu2 %v902_v18, %s1041_s21 }
  0xa4   : > { %v320_v20 = vpop.permute.xlu0 %319  ;;  %v555_v48 = vsel %vm541_vm1, %v210_v44, %v328_v19 }
  0xa5   : > { %v520_v21 = vpop.permute.xlu2 %519  ;;  %v551_v47 = vsel %vm541_vm1, %v206_v41, %v320_v20  ;;  %v572_v50 = vsel %vm558_vm2, %v555_v48, %v392_v9  ;;  %v203_v41 = vld [vmem:[%s1088_s19 + $0x30] sm:$0xff] }
  0xa9   : > { %371 = vrot.lane.b32.xlu1 %v918_v22, %s1040_s20  ;;  %v211_v22 = vld [vmem:[%s1088_s19 + $0x70] sm:$0xff] }
  0xaa   : > { %315 = vrot.lane.b32.xlu0 %v906_v23, %s1041_s21 }
  0xab   : > { %v384_v26 = vpop.permute.xlu1 %383  ;;  %379 = vrot.lane.b32.xlu2 %v922_v24, %s1040_s20 }
  0xac   : > { %v438_v27 = vpop.permute.xlu0 %437  ;;  %v568_v49 = vsel %vm558_vm2, %v551_v47, %v384_v26 }
  0xad   : > { %v368_v30 = vpop.permute.xlu2 %367  ;;  %v580_v38 = vsel %vm575_vm3, %v563_v36, %v438_v27  ;;  %v585_v51 = vsel %vm575_vm3, %v568_v49, %v448_v15  ;;  %v207_v15 = vld [vmem:[%s1088_s19 + $0x50] sm:$0xff] }
  0xb1   : > { %443 = vrot.lane.b32.xlu1 %v938_v31, %s1042_s22 }
  0xb2   : > { %435 = vrot.lane.b32.xlu0 %v934_v32, %s1042_s22 }
  0xb3   : > { %v502_v39 = vpop.permute.xlu1 %501  ;;  %499 = vrot.lane.b32.xlu2 %v950_v35, %s1043_s23 }
  0xb4   : > { %v494_v40 = vpop.permute.xlu0 %493  ;;  %v597_v43 = vsel %vm592_vm4, %v580_v38, %v502_v39 }
  0xb5   : > { %v593_v42 = vsel %vm592_vm4, %v576_v37, %v494_v40  ;;  %968 = vmatmul.msk.f32.vlgmr.msra.gmra.mxu1 %vm613_vm5, %v597_v43  ;;  %v330_v45 = vpop.permute.xlu2 %329 }
  0xb6   : > { %964 = vmatmul.msk.f32.vlgmr.msra.gmra.mxu0 %vm613_vm5, %v593_v42  ;;  %v556_v24 = vsel %vm541_vm1, %v211_v22, %v330_v45 }
  0xba   : > { %507 = vrot.lane.b32.xlu0 %v954_v46, %s1043_s23 }
  0xbb   : > { %v512_v52 = vpop.permute.xlu1 %511 }
  0xbc   : > { %v456_v53 = vpop.permute.xlu0 %455  ;;  %v602_v55 = vsel %vm592_vm4, %v585_v51, %v512_v52 }
  0xbd   : > { %v589_v54 = vsel %vm575_vm3, %v572_v50, %v456_v53  ;;  %973 = vmatmul.msk.f32.gmra.mxu2 %vm613_vm5, %v602_v55  ;;  %v386_v57 = vpop.permute.xlu2 %385  ;;  %v212_v50 = vld [vmem:[%s1088_s19 + $0x78] sm:$0xff] }
  0xbe   : > { %v606_v56 = vsel %vm592_vm4, %v589_v54, %v520_v21  ;;  %v208_v53 = vld [vmem:[%s1088_s19 + $0x58] sm:$0xff] }
  0xbf   : > { %977 = vmatmul.msk.f32.gmra.mxu3 %vm613_vm5, %v606_v56 }
  0xc3   : > { %v312_v58 = vpop.permute.xlu1 %311 }
  0xc4   : > { %v304_v59 = vpop.permute.xlu0 %303  ;;  %v547_v0 = vsel %vm541_vm1, %v202_v63, %v312_v58 }
  0xc5   : > { %v504_v60 = vpop.permute.xlu2 %503  ;;  %v543_v8 = vsel %vm541_vm1, %v198_v5, %v304_v59 }
  0xc6   : > { %v560_v9 = vsel %vm558_vm2, %v543_v8, %v368_v30 }
  0xcb   : > { %v322_v61 = vpop.permute.xlu1 %321 }
  0xcc   : > { %v376_v62 = vpop.permute.xlu0 %375  ;;  %v552_v16 = vsel %vm541_vm1, %v207_v15, %v322_v61 }
  0xcd   : > { %v514_v1 = vpop.permute.xlu2 %513  ;;  %v564_v2 = vsel %vm558_vm2, %v547_v0, %v376_v62  ;;  %v569_v17 = vsel %vm558_vm2, %v552_v16, %v386_v57  ;;  %v1314_v0 = vld [vmem:[%s1393_s2] ss:$0 sm:$0xff] }
  0xd3   : > { %v440_v3 = vpop.permute.xlu1 %439 }
  0xd4   : > { %v432_v4 = vpop.permute.xlu0 %431  ;;  %v581_v6 = vsel %vm575_vm3, %v564_v2, %v440_v3 }
  0xd5   : > { %v598_v7 = vsel %vm592_vm4, %v581_v6, %v504_v60  ;;  %v577_v10 = vsel %vm575_vm3, %v560_v9, %v432_v4  ;;  %v314_v14 = vpop.permute.xlu2 %313  ;;  %v200_v9 = vld [vmem:[%s1088_s19 + $0x18] sm:$0xff] }
  0xd6   : > { %969 = vmatmul.msk.f32.gmra.mxu1 %vm613_vm5, %v598_v7  ;;  %v548_v44 = vsel %vm541_vm1, %v203_v41, %v314_v14 }
  0xdb   : > { %v496_v11 = vpop.permute.xlu1 %495 }
  0xdc   : > { %v394_v12 = vpop.permute.xlu0 %393  ;;  %v594_v13 = vsel %vm592_vm4, %v577_v10, %v496_v11 }
  0xdd   : > { %965 = vmatmul.msk.f32.gmra.mxu0 %vm613_vm5, %v594_v13  ;;  %v324_v23 = vpop.permute.xlu2 %323  ;;  %v573_v25 = vsel %vm558_vm2, %v556_v24, %v394_v12 }
  0xde   : > { %v553_v56 = vsel %vm541_vm1, %v208_v53, %v324_v23 }
  0xe3   : > { %v458_v18 = vpop.permute.xlu1 %457 }
  0xe4   : > { %v450_v19 = vpop.permute.xlu0 %449  ;;  %v590_v26 = vsel %vm575_vm3, %v573_v25, %v458_v18 }
  0xe5   : > { %v586_v20 = vsel %vm575_vm3, %v569_v17, %v450_v19  ;;  %v442_v30 = vpop.permute.xlu2 %441  ;;  %v204_v17 = vld [vmem:[%s1088_s19 + $0x38] sm:$0xff] }
  0xe6   : > { %v603_v21 = vsel %vm592_vm4, %v586_v20, %v514_v1 }
  0xe7   : > { %974 = vmatmul.msk.f32.gmra.mxu2 %vm613_vm5, %v603_v21 }
  0xeb   : > { %v306_v27 = vpop.permute.xlu1 %305 }
  0xec   : > { %v522_v28 = vpop.permute.xlu0 %521  ;;  %v544_v34 = vsel %vm541_vm1, %v199_v33, %v306_v27 }
  0xed   : > { %v607_v29 = vsel %vm592_vm4, %v590_v26, %v522_v28  ;;  %v498_v35 = vpop.permute.xlu2 %497 }
  0xee   : > { %978 = vmatmul.msk.f32.gmra.mxu3 %vm613_vm5, %v607_v29 }
  0xf3   : > { %v378_v31 = vpop.permute.xlu1 %377 }
  0xf4   : > { %v370_v32 = vpop.permute.xlu0 %369  ;;  %v565_v46 = vsel %vm558_vm2, %v548_v44, %v378_v31 }
  0xf5   : > { %v561_v36 = vsel %vm558_vm2, %v544_v34, %v370_v32  ;;  %v460_v45 = vpop.permute.xlu2 %459  ;;  %v582_v47 = vsel %vm575_vm3, %v565_v46, %v442_v30 }
  0xfb   : > { %v434_v37 = vpop.permute.xlu1 %433 }
  0xfc   : > { %v332_v38 = vpop.permute.xlu0 %331  ;;  %v578_v39 = vsel %vm575_vm3, %v561_v36, %v434_v37 }
  0xfd   : > { %v595_v40 = vsel %vm592_vm4, %v578_v39, %v498_v35  ;;  %v308_v52 = vpop.permute.xlu2 %307  ;;  %v557_v54 = vsel %vm541_vm1, %v212_v50, %v332_v38 }
  0xfe   : > { %966 = vmatmul.msk.f32.gmra.mxu0 %vm613_vm5, %v595_v40  ;;  %v545_v13 = vsel %vm541_vm1, %v200_v9, %v308_v52 }
 0x103   : > { %v396_v42 = vpop.permute.xlu1 %395 }
 0x104   : > { %v388_v43 = vpop.permute.xlu0 %387  ;;  %v574_v55 = vsel %vm558_vm2, %v557_v54, %v396_v42 }
 0x105   : > { %v570_v57 = vsel %vm558_vm2, %v553_v56, %v388_v43  ;;  %v591_v58 = vsel %vm575_vm3, %v574_v55, %v460_v45  ;;  %v380_v1 = vpop.permute.xlu2 %379 }
 0x10b   : > { %v452_v48 = vpop.permute.xlu1 %451 }
 0x10c   : > { %v506_v49 = vpop.permute.xlu0 %505  ;;  %v587_v59 = vsel %vm575_vm3, %v570_v57, %v452_v48 }
 0x10d   : > { %v599_v51 = vsel %vm592_vm4, %v582_v47, %v506_v49  ;;  %v500_v14 = vpop.permute.xlu2 %499 }
 0x10e   : > { %970 = vmatmul.msk.f32.gmra.mxu1 %vm613_vm5, %v599_v51 }
 0x113   : > { %v524_v60 = vpop.permute.xlu1 %523 }
 0x114   : > { %v516_v61 = vpop.permute.xlu0 %515  ;;  %v608_v63 = vsel %vm592_vm4, %v591_v58, %v524_v60 }
 0x115   : > { %v604_v62 = vsel %vm592_vm4, %v587_v59, %v516_v61  ;;  %979 = vmatmul.msk.f32.gmra.mxu3 %vm613_vm5, %v608_v63 }
 0x116   : > { %975 = vmatmul.msk.f32.gmra.mxu2 %vm613_vm5, %v604_v62 }
 0x118   : > { %v719_v3 = vpop.f32.mrf.mxu3 }
 0x119   : > { %v707_v2 = vpop.f32.mrf.mxu2  ;;  %v720_v5 = vadd.f32 %v1314_v0, %v719_v3 }
 0x11a   : > { %v708_v4 = vadd.f32 %v1314_v0, %v707_v2 }
 0x11b   : > { %vm743_vm8 = vcmp.ge.f32.partialorder %v720_v5, 0.0  ;;  %v759_v7 = vmul.f32 0.1, %v720_v5  ;;  %v372_v12 = vpop.permute.xlu1 %371 }
 0x11c   : > { %vm739_vm7 = vcmp.ge.f32.partialorder %v708_v4, 0.0  ;;  %v755_v6 = vmul.f32 0.1, %v708_v4  ;;  %v316_v8 = vpop.permute.xlu0 %315  ;;  %v562_v15 = vsel %vm558_vm2, %v545_v13, %v372_v12 }
 0x11d   : > { %v775_v11 = vsel %vm743_vm8, %v720_v5, %v759_v7  ;;  %v549_v20 = vsel %vm541_vm1, %v204_v17, %v316_v8 }
 0x11e   : > { %v771_v10 = vsel %vm739_vm7, %v708_v4, %v755_v6  ;;  %792 = vst.msk [vmem:[%s1322_s4 + $0x60] sm:$0xff] %vm779_vm6, %v775_v11  ;;  %v566_v22 = vsel %vm558_vm2, %v549_v20, %v380_v1 }
 0x11f   : > { %788 = vst.msk [vmem:[%s1322_s4 + $0x40] sm:$0xff] %vm779_vm6, %v771_v10 }
 0x123   : > { %v444_v21 = vpop.permute.xlu1 %443 }
 0x124   : > { %v436_v16 = vpop.permute.xlu0 %435  ;;  %v583_v23 = vsel %vm575_vm3, %v566_v22, %v444_v21 }
 0x125   : > { %v579_v18 = vsel %vm575_vm3, %v562_v15, %v436_v16 }
 0x126   : > { %v596_v19 = vsel %vm592_vm4, %v579_v18, %v500_v14 }
 0x127   : > { %967 = vmatmul.msk.f32.gmra.mxu0 %vm613_vm5, %v596_v19 }
 0x12c   : > { %v508_v24 = vpop.permute.xlu0 %507 }
 0x12d   : > { %v600_v25 = vsel %vm592_vm4, %v583_v23, %v508_v24 }
 0x12e   : > { %971 = vmatmul.msk.f32.gmra.mxu1 %vm613_vm5, %v600_v25 }
 0x132   : > { %v695_v27 = vpop.f32.mrf.mxu1 }
 0x133   : > { %v683_v26 = vpop.f32.mrf.mxu0  ;;  %v696_v29 = vadd.f32 %v1314_v0, %v695_v27 }
 0x134   : > { %v684_v28 = vadd.f32 %v1314_v0, %v683_v26 }
 0x135   : > { %vm735_vm10 = vcmp.ge.f32.partialorder %v696_v29, 0.0  ;;  %v751_v31 = vmul.f32 0.1, %v696_v29 }
 0x136   : > { %vm731_vm9 = vcmp.ge.f32.partialorder %v684_v28, 0.0  ;;  %v747_v30 = vmul.f32 0.1, %v684_v28 }
 0x137   : > { %v767_v33 = vsel %vm735_vm10, %v696_v29, %v751_v31 }
 0x138   : > { %v763_v32 = vsel %vm731_vm9, %v684_v28, %v747_v30  ;;  %784 = vst.msk [vmem:[%s1322_s4 + $0x20] sm:$0xff] %vm779_vm6, %v767_v33 }
 0x139   : > { %780 = vst.msk [vmem:[%s1322_s4] sm:$0xff] %vm779_vm6, %v763_v32 }
 0x140   : > { %v710_v34 = vpop.f32.mrf.mxu2 }
 0x141   : > { %v711_v35 = vadd.f32 %v1314_v0, %v710_v34 }
 0x142   : > { %v722_v36 = vpop.f32.mrf.mxu3 }
 0x143   : > { %v723_v37 = vadd.f32 %v1314_v0, %v722_v36  ;;  %vm740_vm11 = vcmp.ge.f32.partialorder %v711_v35, 0.0  ;;  %v756_v38 = vmul.f32 0.1, %v711_v35 }
 0x145   : > { %vm744_vm12 = vcmp.ge.f32.partialorder %v723_v37, 0.0  ;;  %v760_v39 = vmul.f32 0.1, %v723_v37  ;;  %v772_v40 = vsel %vm740_vm11, %v711_v35, %v756_v38 }
 0x146   : > { %789 = vst.msk [vmem:[%s1322_s4 + $0x48] sm:$0xff] %vm779_vm6, %v772_v40 }
 0x147   : > { %v776_v41 = vsel %vm744_vm12, %v723_v37, %v760_v39 }
 0x148   : > { %793 = vst.msk [vmem:[%s1322_s4 + $0x68] sm:$0xff] %vm779_vm6, %v776_v41 }
 0x153   : > { %v698_v42 = vpop.f32.mrf.mxu1 }
 0x154   : > { %v699_v43 = vadd.f32 %v1314_v0, %v698_v42 }
 0x156   : > { %vm736_vm13 = vcmp.ge.f32.partialorder %v699_v43, 0.0  ;;  %v752_v44 = vmul.f32 0.1, %v699_v43 }
 0x158   : > { %v768_v45 = vsel %vm736_vm13, %v699_v43, %v752_v44 }
 0x159   : > { %785 = vst.msk [vmem:[%s1322_s4 + $0x28] sm:$0xff] %vm779_vm6, %v768_v45 }
 0x15a   : > { %v686_v46 = vpop.f32.mrf.mxu0 }
 0x15b   : > { %v687_v47 = vadd.f32 %v1314_v0, %v686_v46 }
 0x15d   : > { %vm732_vm14 = vcmp.ge.f32.partialorder %v687_v47, 0.0  ;;  %v748_v48 = vmul.f32 0.1, %v687_v47 }
 0x15f   : > { %v764_v49 = vsel %vm732_vm14, %v687_v47, %v748_v48 }
 0x160   : > { %781 = vst.msk [vmem:[%s1322_s4 + $0x8] sm:$0xff] %vm779_vm6, %v764_v49 }
 0x16a   : > { %v713_v50 = vpop.f32.mrf.mxu2 }
 0x16b   : > { %v714_v51 = vadd.f32 %v1314_v0, %v713_v50 }
 0x16d   : > { %vm741_vm15 = vcmp.ge.f32.partialorder %v714_v51, 0.0  ;;  %v757_v52 = vmul.f32 0.1, %v714_v51 }
 0x16f   : > { %v773_v53 = vsel %vm741_vm15, %v714_v51, %v757_v52 }
 0x170   : > { %790 = vst.msk [vmem:[%s1322_s4 + $0x50] sm:$0xff] %vm779_vm6, %v773_v53 }
 0x171   : > { %v725_v54 = vpop.f32.mrf.mxu3 }
 0x172   : > { %v726_v55 = vadd.f32 %v1314_v0, %v725_v54 }
 0x174   : > { %vm745_vm0 = vcmp.ge.f32.partialorder %v726_v55, 0.0  ;;  %v761_v56 = vmul.f32 0.1, %v726_v55 }
 0x176   : > { %v777_v57 = vsel %vm745_vm0, %v726_v55, %v761_v56 }
 0x177   : > { %794 = vst.msk [vmem:[%s1322_s4 + $0x70] sm:$0xff] %vm779_vm6, %v777_v57 }
 0x17b   : > { %v689_v58 = vpop.f32.mrf.mxu0 }
 0x17c   : > { %v690_v59 = vadd.f32 %v1314_v0, %v689_v58 }
 0x17e   : > { %vm733_vm1 = vcmp.ge.f32.partialorder %v690_v59, 0.0  ;;  %v749_v60 = vmul.f32 0.1, %v690_v59 }
 0x180   : > { %v765_v61 = vsel %vm733_vm1, %v690_v59, %v749_v60 }
 0x181   : > { %782 = vst.msk [vmem:[%s1322_s4 + $0x10] sm:$0xff] %vm779_vm6, %v765_v61 }
 0x18b   : > { %v701_v62 = vpop.f32.mrf.mxu1 }
 0x18c   : > { %v702_v63 = vadd.f32 %v1314_v0, %v701_v62 }
 0x18e   : > { %vm737_vm2 = vcmp.ge.f32.partialorder %v702_v63, 0.0  ;;  %v753_v1 = vmul.f32 0.1, %v702_v63 }
 0x190   : > { %v769_v2 = vsel %vm737_vm2, %v702_v63, %v753_v1 }
 0x191   : > { %786 = vst.msk [vmem:[%s1322_s4 + $0x30] sm:$0xff] %vm779_vm6, %v769_v2 }
 0x198   : > { %v728_v4 = vpop.f32.mrf.mxu3 }
 0x199   : > { %v716_v3 = vpop.f32.mrf.mxu2  ;;  %v729_v6 = vadd.f32 %v1314_v0, %v728_v4 }
 0x19a   : > { %v717_v5 = vadd.f32 %v1314_v0, %v716_v3 }
 0x19b   : > { %vm746_vm4 = vcmp.ge.f32.partialorder %v729_v6, 0.0  ;;  %v762_v8 = vmul.f32 0.1, %v729_v6 }
 0x19c   : > { %vm742_vm3 = vcmp.ge.f32.partialorder %v717_v5, 0.0  ;;  %v758_v7 = vmul.f32 0.1, %v717_v5 }
 0x19d   : > { %v778_v10 = vsel %vm746_vm4, %v729_v6, %v762_v8 }
 0x19e   : > { %v774_v9 = vsel %vm742_vm3, %v717_v5, %v758_v7  ;;  %795 = vst.msk [vmem:[%s1322_s4 + $0x78] sm:$0xff] %vm779_vm6, %v778_v10 }
 0x19f   : > { %791 = vst.msk [vmem:[%s1322_s4 + $0x58] sm:$0xff] %vm779_vm6, %v774_v9 }
 0x1a4   : > { %v692_v11 = vpop.f32.mrf.mxu0 }
 0x1a5   : > { %v693_v12 = vadd.f32 %v1314_v0, %v692_v11 }
 0x1a7   : > { %vm734_vm5 = vcmp.ge.f32.partialorder %v693_v12, 0.0  ;;  %v750_v13 = vmul.f32 0.1, %v693_v12 }
 0x1a9   : > { %v766_v14 = vsel %vm734_vm5, %v693_v12, %v750_v13 }
 0x1aa   : > { %783 = vst.msk [vmem:[%s1322_s4 + $0x18] sm:$0xff] %vm779_vm6, %v766_v14 }
 0x1ab   : > { %v704_v15 = vpop.f32.mrf.mxu1 }
 0x1ac   : > { %v705_v16 = vadd.f32 %v1314_v0, %v704_v15 }
 0x1ae   : > { %vm738_vm7 = vcmp.ge.f32.partialorder %v705_v16, 0.0  ;;  %v754_v17 = vmul.f32 0.1, %v705_v16 }
 0x1b0   : > { %v770_v18 = vsel %vm738_vm7, %v705_v16, %v754_v17 }
 0x1b1   : > { %787 = vst.msk [vmem:[%s1322_s4 + $0x38] sm:$0xff] %vm779_vm6, %v770_v18 }
 0x1b2 PF: > { %s13_s14 = sadd.s32 1, %s1038_s14   ;;  %s1395_s12 = smov %s1034_s13 }
 0x1b3   : > { %p10_p5 = scmp.ge.s32.totalorder %s13_s14, 4   ;;  %s1396_s13 = smov %s1398_s15 }
 0x1b5   :  { %12 = sbr.rel (!%p10_p5) target bundleno = 2 (0x2), region = 67 }

</bundles_post_ra>
